<compile_context>
chip_gen: v6e
topology: v6e:2x2x1
jax: 0.10.0
libtpu: 0.0.40
codegen_flags: <defaults>
</compile_context>

<pallas_src>
import functools

import numpy as np
import jax
import jax.numpy as jnp
from jax import lax
from jax.experimental import pallas as pl
from jax.experimental.pallas import tpu as pltpu


# --------------------------------------------------------------------------
# Kernels
# --------------------------------------------------------------------------
def _sa_mxu_kernel(x_ref, m_ref, o_ref):
    """MXU path. x_ref: (NB, C, HW); m_ref: (2*HW, HW) f32 conv matrix."""
    x = x_ref[...]                                        # (NB, C, HW), native dtype
    xf = x.astype(jnp.float32)
    mean_c = jnp.mean(xf, axis=1)                         # (NB, HW)
    max_c = jnp.max(xf, axis=1)                           # (NB, HW)
    feats = jnp.concatenate([mean_c, max_c], axis=1)      # (NB, 2*HW)
    conv = jnp.dot(feats, m_ref[...],
                   preferred_element_type=jnp.float32)    # (NB, HW) on the MXU
    sa = jax.nn.sigmoid(conv)                             # (NB, HW)
    o_ref[...] = (x * sa[:, None, :].astype(x.dtype)).astype(o_ref.dtype)


def _sa_roll_kernel(x_ref, w_ref, o_ref, *, ksize, height, width, n_acc=2):
    """Roll/XLU fallback path. x_ref: (NB, C, HW); w_ref: (2*k*k,) f32 SMEM."""
    x = x_ref[...]                                        # (NB, C, HW)
    xf = x.astype(jnp.float32)
    nb, _, hw = x.shape
    pad = ksize // 2
    kk = ksize * ksize

    mean_s = jnp.mean(xf, axis=1)                         # (NB, HW)
    max_s = jnp.max(xf, axis=1)                           # (NB, HW)

    # Lane-only coordinate masks, built once at (1, HW) and hoisted.
    flat = lax.broadcasted_iota(jnp.int32, (1, hw), 1)
    wpos = flat % width
    hpos = flat // width
    col_f = []
    for dx in range(ksize):
        wq = wpos + (dx - pad)
        col_f.append(((wq >= 0) & (wq < width)).astype(jnp.float32))
    row_f = []
    for dy in range(ksize):
        hq = hpos + (dy - pad)
        row_f.append(((hq >= 0) & (hq < height)).astype(jnp.float32))

    zeros = jnp.zeros((nb, hw), jnp.float32)
    acc_mean = [zeros] * n_acc
    acc_max = [zeros] * n_acc

    for dy in range(ksize):
        for dx in range(ksize):
            t = dy * ksize + dx
            off = (dy - pad) * width + (dx - pad)
            # (1, HW) float mask combined with the scalar SMEM weight: the
            # per-tap wide ops are just one multiply + one add per channel.
            mask = row_f[dy] * col_f[dx]
            if off == 0:
                rm, rx = mean_s, max_s
            else:
                sh = (-off) % hw                          # rolled[q] == in[q + off]
                rm = pltpu.roll(mean_s, shift=sh, axis=1)
                rx = pltpu.roll(max_s, shift=sh, axis=1)
            slot = t % n_acc
            acc_mean[slot] = acc_mean[slot] + rm * (mask * w_ref[t])
            acc_max[slot] = acc_max[slot] + rx * (mask * w_ref[kk + t])

    conv = functools.reduce(lambda a, b: a + b, acc_mean + acc_max)  # (NB, HW)
    sa = jax.nn.sigmoid(conv)
    o_ref[...] = (x * sa[:, None, :].astype(x.dtype)).astype(o_ref.dtype)


# --------------------------------------------------------------------------
# Wrapper helpers
# --------------------------------------------------------------------------
def _vmem_capacity_bytes():
    try:
        return int(pltpu.get_tpu_info().vmem_capacity_bytes)
    except Exception:
        return 64 * 1024 * 1024  # conservative (v7x-sized) default


def _pick_batch_block(n, c, hw, itemsize, max_block_bytes, min_steps=1):
    """Largest divisor of n whose (c, hw) block fits max_block_bytes and leaves
    at least `min_steps` grid steps (keeps both v7x TensorCores busy)."""
    per_image = max(1, c * hw * itemsize)
    cap = max(1, max_block_bytes // per_image)
    cap = min(cap, max(1, n // min(min_steps, n)))
    nb = min(n, cap)
    while n % nb != 0:
        nb -= 1
    # TODO(synk): add a channel-tiled (C as "arbitrary" grid axis) two-pass path
    # for shapes where a single image (C*HW*itemsize) exceeds max_block_bytes.
    return nb


def _build_conv_matrix(w_conv, H, W, ksize):
    """Fold Conv2d(2->1, k, pad=k//2, bias=False) into a (2*HW, HW) matrix M so
    that conv_flat = concat([mean, max], axis=-1) @ M (zero padding included)."""
    pad = ksize // 2
    HW = H * W
    hh, ww = np.meshgrid(np.arange(H), np.arange(W), indexing="ij")
    q = (hh * W + ww).reshape(-1)                         # output flat positions
    w = jnp.asarray(w_conv, jnp.float32).reshape(2, ksize, ksize)
    M = jnp.zeros((2 * HW, HW), jnp.float32)
    for dy in range(ksize):
        ih = hh + dy - pad
        for dx in range(ksize):
            iw = ww + dx - pad
            valid = ((ih >= 0) & (ih < H) & (iw >= 0) & (iw < W)).reshape(-1)
            p = (np.clip(ih, 0, H - 1) * W + np.clip(iw, 0, W - 1)).reshape(-1)
            rows = p[valid]
            cols = q[valid]
            for c in range(2):
                M = M.at[c * HW + rows, cols].add(w[c, dy, dx])
    return M


# --------------------------------------------------------------------------
# Public forward
# --------------------------------------------------------------------------
def spatial_attention_forward(x, w_conv, *, kernel_size=7, use_mxu=None):
    """x: (N, C, H, W); w_conv: (1, 2, k, k) = nn.Conv2d(2, 1, k, bias=False).weight."""
    assert kernel_size in (3, 7), "kernel size must be 3 or 7"
    N, C, H, W = x.shape
    HW = H * W

    # Lane-dense presentation (free for contiguous NCHW layout).
    # TODO(synk): pad the HW axis to a multiple of 128 (and zero the extra conv
    # matrix rows/cols) when HW % 128 != 0 to keep stores unmasked.
    x_flat = x.reshape(N, C, HW)

    # Generation-aware sizing.
    vmem_cap = _vmem_capacity_bytes()
    big_vmem = vmem_cap >= 100 * 1024 * 1024              # v5e / v6e (128 MiB)
    max_block_bytes = (10 if big_vmem else 4) * 1024 * 1024
    vmem_limit = (64 if big_vmem else 48) * 1024 * 1024
    min_steps = 1 if big_vmem else 2                      # v7x: 2 TCs

    nb = _pick_batch_block(N, C, HW, x.dtype.itemsize, max_block_bytes, min_steps)
    grid = (N // nb,)

    if use_mxu is None:
        use_mxu = (2 * HW * HW * 4) <= 8 * 1024 * 1024    # conv matrix VMEM budget

    compiler_params = pltpu.CompilerParams(
        dimension_semantics=("parallel",),                # batch blocks independent
        vmem_limit_bytes=vmem_limit,
    )

    if use_mxu:
        conv_mat = _build_conv_matrix(w_conv, H, W, kernel_size)     # (2*HW, HW)
        out_flat = pl.pallas_call(
            _sa_mxu_kernel,
            out_shape=jax.ShapeDtypeStruct((N, C, HW), x.dtype),
            grid_spec=pltpu.PrefetchScalarGridSpec(
                num_scalar_prefetch=0,
                grid=grid,
                in_specs=[
                    pl.BlockSpec((nb, C, HW), lambda n: (n, 0, 0)),   # batch block
                    pl.BlockSpec((2 * HW, HW), lambda n: (0, 0)),     # resident matrix
                ],
                out_specs=pl.BlockSpec((nb, C, HW), lambda n: (n, 0, 0)),
            ),
            compiler_params=compiler_params,
        )(x_flat, conv_mat)
    else:
        w_flat = w_conv.reshape(2 * kernel_size * kernel_size).astype(jnp.float32)
        kern = functools.partial(
            _sa_roll_kernel, ksize=kernel_size, height=H, width=W)
        out_flat = pl.pallas_call(
            kern,
            out_shape=jax.ShapeDtypeStruct((N, C, HW), x.dtype),
            grid_spec=pltpu.PrefetchScalarGridSpec(
                num_scalar_prefetch=0,
                grid=grid,
                in_specs=[
                    pl.BlockSpec((nb, C, HW), lambda n: (n, 0, 0)),       # batch block
                    pl.BlockSpec(memory_space=pltpu.MemorySpace.SMEM),    # conv weights
                ],
                out_specs=pl.BlockSpec((nb, C, HW), lambda n: (n, 0, 0)),
            ),
            compiler_params=compiler_params,
        )(x_flat, w_flat)

    return out_flat.reshape(N, C, H, W)


# --------------------------------------------------------------------------
# Pure-JAX reference (mirrors the PyTorch SpatialAttention module)
# --------------------------------------------------------------------------
def spatial_attention_ref(x, w_conv, kernel_size=7):
    pad = 3 if kernel_size == 7 else 1
    mean_c = jnp.mean(x, axis=1, keepdims=True)
    max_c = jnp.max(x, axis=1, keepdims=True)
    s = jnp.concatenate([mean_c, max_c], axis=1)          # (N, 2, H, W)
    conv = jax.lax.conv_general_dilated(
        s, w_conv, window_strides=(1, 1), padding=[(pad, pad), (pad, pad)],
        dimension_numbers=('NCHW', 'OIHW', 'NCHW'))
    return x * jax.nn.sigmoid(conv)


if __name__ == "__main__":
    key = jax.random.PRNGKey(0)
    k1, k2 = jax.random.split(key)

    N, C, H, W = 2, 4, 16, 16
    kernel_size = 7

    x = jax.random.normal(k1, (N, C, H, W), jnp.float32)
    # nn.Conv2d(2, 1, kernel_size, padding=kernel_size//2, bias=False) weight:
    w_conv = jax.random.normal(k2, (1, 2, kernel_size, kernel_size), jnp.float32) * 0.1

    ref = spatial_attention_ref(x, w_conv, kernel_size)

    # MXU path (default for this shape).
    out_mxu = jax.block_until_ready(
        spatial_attention_forward(x, w_conv, kernel_size=kernel_size))
    np.testing.assert_allclose(np.asarray(out_mxu), np.asarray(ref),
                               rtol=1e-4, atol=1e-4)

    # Roll/XLU fallback path (exercised explicitly).
    out_roll = jax.block_until_ready(
        spatial_attention_forward(x, w_conv, kernel_size=kernel_size, use_mxu=False))
    np.testing.assert_allclose(np.asarray(out_roll), np.asarray(ref),
                               rtol=1e-4, atol=1e-4)

    print("KERNEL_OK")
</pallas_src>

<mosaic_0001>
module attributes {stable_mosaic.version = 11 : i64} {
  func.func @_sa_mxu_kernel(%arg0: i32, %arg1: memref<1x4x256xf32, #tpu.memory_space<vmem>>, %arg2: memref<512x256xf32, #tpu.memory_space<vmem>>, %arg3: memref<1x4x256xf32, #tpu.memory_space<vmem>>) attributes {dimension_semantics = [#tpu.dimension_semantics<parallel>], iteration_bounds = array<i64: 2>, scalar_prefetch = 0 : i64, scratch_operands = 0 : i64, tpu.core_type = #tpu.core_type<tc>, window_params = [{transform_indices = @transform_0, window_bounds = array<i64: 1, 4, 256>}, {pipeline_mode = #tpu.pipeline_mode<synchronous>, transform_indices = @transform_1, window_bounds = array<i64: 512, 256>}, {transform_indices = @transform_2, window_bounds = array<i64: 1, 4, 256>}]} {
    %c0 = arith.constant 0 : index
    %c0_0 = arith.constant 0 : index
    %c0_1 = arith.constant 0 : index
    %0 = vector.load %arg1[%c0, %c0_0, %c0_1] : memref<1x4x256xf32, #tpu.memory_space<vmem>>, vector<1x4x256xf32>
    %cst = arith.constant dense<0.000000e+00> : vector<1x256xf32>
    %1 = vector.multi_reduction <add>, %0, %cst [1] : vector<1x4x256xf32> to vector<1x256xf32>
    %cst_2 = arith.constant 4.000000e+00 : f32
    %2 = vector.broadcast %cst_2 : f32 to vector<1x256xf32>
    %3 = arith.divf %1, %2 : vector<1x256xf32>
    %cst_3 = arith.constant dense<0xFF800000> : vector<1x256xf32>
    %4 = vector.multi_reduction <maximumf>, %0, %cst_3 [1] : vector<1x4x256xf32> to vector<1x256xf32>
    %5 = tpu.concatenate %3, %4 in 1 : vector<1x256xf32>, vector<1x256xf32> -> vector<1x512xf32>
    %c0_4 = arith.constant 0 : index
    %c0_5 = arith.constant 0 : index
    %6 = vector.load %arg2[%c0_4, %c0_5] : memref<512x256xf32, #tpu.memory_space<vmem>>, vector<512x256xf32>
    %cst_6 = arith.constant dense<0.000000e+00> : vector<1x256xf32>
    %7 = tpu.matmul %5, %6, %cst_6 {dimension_numbers = #tpu.dot_dimension_numbers<[1], [0], [0], [1], [0, 0, 1, 1], [], []>} : vector<1x512xf32>, vector<512x256xf32>, vector<1x256xf32> -> vector<1x256xf32>
    %8 = arith.negf %7 : vector<1x256xf32>
    %9 = math.exp %8 : vector<1x256xf32>
    %cst_7 = arith.constant 1.000000e+00 : f32
    %10 = vector.broadcast %cst_7 : f32 to vector<1x256xf32>
    %11 = arith.addf %10, %9 : vector<1x256xf32>
    %12 = arith.divf %10, %11 : vector<1x256xf32>
    %13 = vector.shape_cast %12 : vector<1x256xf32> to vector<1x1x256xf32>
    %14 = vector.broadcast %13 : vector<1x1x256xf32> to vector<1x4x256xf32>
    %15 = arith.mulf %0, %14 : vector<1x4x256xf32>
    %c0_8 = arith.constant 0 : index
    %c0_9 = arith.constant 0 : index
    %c0_10 = arith.constant 0 : index
    %16 = vector.load %arg3[%c0_8, %c0_9, %c0_10] : memref<1x4x256xf32, #tpu.memory_space<vmem>>, vector<1x4x256xf32>
    tpu.vector_store %arg3[%c0_8, %c0_9, %c0_10], %15 {strides = array<i32>} : memref<1x4x256xf32, #tpu.memory_space<vmem>>, vector<1x4x256xf32>,
    return
  }
  func.func @transform_0(%arg0: i32) -> (i32, i32, i32) {
    %c0_i32 = arith.constant 0 : i32
    %c0_i32_0 = arith.constant 0 : i32
    %c0_i32_1 = arith.constant 0 : i32
    return %arg0, %c0_i32, %c0_i32_0 : i32, i32, i32
  }
  func.func @transform_1(%arg0: i32) -> (i32, i32) {
    %c0_i32 = arith.constant 0 : i32
    %c0_i32_0 = arith.constant 0 : i32
    %c0_i32_1 = arith.constant 0 : i32
    return %c0_i32, %c0_i32_0 : i32, i32
  }
  func.func @transform_2(%arg0: i32) -> (i32, i32, i32) {
    %c0_i32 = arith.constant 0 : i32
    %c0_i32_0 = arith.constant 0 : i32
    %c0_i32_1 = arith.constant 0 : i32
    return %arg0, %c0_i32, %c0_i32_0 : i32, i32, i32
  }
}

</mosaic_0001>

<bundles_post_ra>
// kernel: tpu_custom_call.1
= control target key start
LH: loop header
LB: loop body
LE: loop exit
PB: predicated region body
PF: predicated region fallthrough
CT: control target
= control target key end

     0   :  { %7 = vsyncpa [#allocation3], 0  ;;  %s1006_s0 = inlined_call_operand.hbm [shape: f32[2,4,256], index: 0, kind: input, shape index: {}]   ;;  %s1007_s1 = inlined_call_operand.hbm [shape: f32[512,256], index: 1, kind: input, shape index: {}]   ;;  %s1008_s2 = inlined_call_operand.hbm [shape: f32[2,4,256], index: 2, kind: output, shape index: {}]  }
   0x1   :  { %9 = vsyncpa [#allocation3 + $0x1], 0 }
   0x2   :  { %10 = vsyncpa [#allocation6], 0 }
   0x3   :  { %11 = vsyncpa [#allocation4], 0 }
   0x4   :  { %13 = vsyncpa [#allocation4 + $0x1], 0  ;;  %s834_s9 = smov 0   ;;  %s836_s10 = smov 0  }
   0x5   :  { %s838_s11 = smov 0   ;;  %s840_s12 = smov 0  }
   0x6 LB: > { %s855_s13 = sadd.s32 4294967295, %s812_s12   ;;  %s602_s14 = sadd.s32 4294967294, %s812_s12   ;;  %s812_s12 = sphi %s840_s12, %s1030_s12   ;;  %s808_s11 = sphi %s838_s11, %s1029_s11   ;;  %s804_s10 = sphi %s836_s10, %s1028_s10   ;;  %s800_s9 = sphi %s834_s9, %s1027_s9  }
   0x7   : > { %p39_p0 = scmp.ne.s32.totalorder %s804_s10, %s800_s9  ;;  %p1009_p1 = scmp.eq.s32.totalorder %s855_s13, 0 }
   0x8   : > { %p90_p3 = scmp.eq.s32.totalorder %s602_s14, 1  ;;  %p603_p5 = scmp.ge.s32.totalorder %s812_s12, 1 }
   0x9   : > { %p864_p4 = por %p1009_p1, %p39_p0  ;;  %p97_p7 = scmp.lt.s32.totalorder %s812_s12, 3 }
   0xa   : > { %p869_p6 = por %p90_p3, %p39_p0  ;;  %s814_s18 = smov [#allocation5]  }
   0xb   : > { %s1013_s15 = scalar_select %p864_p4, 1, 0 }
   0xc   : > { %s1014_s16 = scalar_select %p869_p6, 1, 0 }
   0xd   : > { %p874_p8 = pnand %p603_p5, %p97_p7  ;;  %s109_s19 = sshll.u32 %s814_s18, 4  ;;  %s110_s19 = int_to_ptr.vmem [resolvable:$true] %s109_s19 }
   0xe   : > { %s888_s21 = sadd.s32 1, %s812_s12   ;;  %s26_s22 = sadd.s32 1, %s808_s11 }
   0xf   : > { %s1015_s17 = scalar_select %p874_p8, 1, 0 }
  0x10   : > { %p630_p9 = pneg %p874_p8  ;;  %s23_s23 = ssub.s32 %s812_s12, %s888_s21 }
  0x11   : > { %s701_s24 = scalar_lea.vmem %s110_s19, 16384  ;;  %p709_p5 = scmp.lt.s32.totalorder %s110_s19, %s110_s19 }
  0x12   : > { %p883_p11 = pnand %p630_p9, %p1009_p1  ;;  %p702_p13 = scmp.ne.s32.totalorder %s110_s19, %s701_s24 }
  0x13   : > { %p710_p7 = scmp.lt.s32.totalorder %s701_s24, %s701_s24 }
  0x14   : > { %p692_p12 = pneg %p883_p11 }
  0x15   : > { %p711_p10 = por %p710_p7, %p709_p5 }
  0x16   : > { %p704_p0 = pnand %p702_p13, %p692_p12 }
  0x18   : > { %p705_p3 = pneg %p704_p0 }
  0x1a   : > { %p712_p2 = pnand %p711_p10, %p705_p3 }
  0x1c   : > { %715 = shalt.err (!%p712_p2)
}
  0x1d   : > { %s815_s25 = smov 256   ;;  %s816_s26 = smov 16  }
  0x1e   : > { %633 = dma.hbm_to_vmem [thread:$0]  (!%p883_p11), %s1007_s1, 16384, %s110_s19, [#allocation6], %s815_s25, %s815_s25, %s816_s26  }
  0x1f   : > { %p24_p9 = scmp.eq.s32.totalorder %s23_s23, 0  ;;  %p33_p12 = scmp.ne.s32.totalorder %s808_s11, %s804_s10 }
  0x20   : > { %p34_p10 = scmp.eq.s32.totalorder %s812_s12, 0  ;;  %p643_p2 = scmp.lt.s32.totalorder %s812_s12, 2 }
  0x21   : > { %s905_s29 = scalar_select %p24_p9, %s808_s11, %s26_s22  }
  0x22   : > { %p35_p13 = por %p34_p10, %p33_p12  ;;  %p1017_p0 = scmp.eq.s32.totalorder %s855_s13, 1 }
  0x23   : > { %s123_s3 = sand.u32 1, %s808_s11   ;;  %s620_s4 = sshll.u32 %s812_s12, 7 }
  0x24   : > { %p909_p3 = por %p1017_p0, %p33_p12  ;;  %s606_s5 = sshll.u32 %s123_s3, 3 }
  0x25   : > { %s918_s8 = scalar_lea.hbm %s1006_s0, %s620_s4  ;;  %s127_s14 = scalar_lea.vmem [#allocation2], %s606_s5 }
  0x26   : > { %s1018_s30 = scalar_select %p909_p3, 1, 0 }
  0x27   : > { %s135_s18 = sshll.u32 %s127_s14, 4  ;;  %p920_p11 = pnand %p643_p2, %p35_p13  ;;  %s136_s18 = int_to_ptr.vmem [resolvable:$true] %s135_s18 }
  0x28   : > { %s124_s20 = scalar_lea.sflag [#allocation3], %s123_s3  ;;  %s716_s22 = scalar_lea.hbm %s918_s8, 128 }
  0x29   : > { %p717_p5 = scmp.ne.s32.totalorder %s918_s8, %s716_s22  ;;  %p718_p7 = pneg %p920_p11 }
  0x2a   : > { %s721_s25 = scalar_lea.hbm %s1006_s0, 256  ;;  %p722_p10 = scmp.lt.s32.totalorder %s918_s8, %s1006_s0 }
  0x2b   : > { %p719_p9 = pnand %p718_p7, %p717_p5  ;;  %p723_p2 = scmp.lt.s32.totalorder %s721_s25, %s716_s22 }
  0x2d   : > { %p720_p12 = pneg %p719_p9  ;;  %p724_p13 = por %p723_p2, %p722_p10 }
  0x2f   : > { %p725_p0 = pnand %p724_p13, %p720_p12 }
  0x31   : > { %728 = shalt.err (!%p725_p0)
}
  0x32   : > { %s729_s28 = scalar_lea.vmem %s136_s18, 128  ;;  %s817_s3 = smov [#allocation2]  }
  0x33   : > { %p730_p1 = scmp.ne.s32.totalorder %s136_s18, %s729_s28  ;;  %s734_s4 = sshll.u32 %s817_s3, 4  ;;  %s735_s4 = int_to_ptr.vmem [resolvable:$false] %s734_s4 }
  0x34   : > { %s736_s5 = scalar_lea.vmem %s735_s4, 256  ;;  %p737_p5 = scmp.lt.s32.totalorder %s136_s18, %s735_s4 }
  0x35   : > { %p732_p6 = pnand %p730_p1, %p718_p7  ;;  %p738_p9 = scmp.lt.s32.totalorder %s736_s5, %s729_s28 }
  0x37   : > { %p733_p3 = pneg %p732_p6  ;;  %p739_p4 = por %p738_p9, %p737_p5 }
  0x39   : > { %p740_p8 = pnand %p739_p4, %p733_p3 }
  0x3b   : > { %743 = shalt.err (!%p740_p8)
}
  0x3c   : > { %637 = dma.hbm_to_vmem [thread:$0]  (!%p920_p11), %s918_s8, 128, %s136_s18, %s124_s20  }
  0x3d   : > { %p1020_p12 = scmp.ne.s32.totalorder %s1015_s17, 0 }
  0x3e   : > { %s941_s6 = sand.u32 (!%p1020_p12), 1, %s804_s10   ;;  %p1021_p1 = scmp.ne.s32.totalorder (!%p1020_p12), %s1013_s15, 0 }
  0x3f   : > { %144 = sbr.rel (%p1020_p12) target bundleno = 387 (0x183), region = 28  ;;  %s610_s7 = sshll.u32 (!%p1020_p12), %s941_s6, 3 }
  0x40   : > { %s147_s14 = scalar_lea.sflag (!%p1020_p12), [#allocation3], %s941_s6  ;;  %s947_s22 = scalar_lea.vmem (!%p1020_p12), [#allocation2], %s610_s7 }
  0x44   : > { %787 = dma.done.wait (%p1021_p1), %s147_s14, 128  }
  0x45   : > { %789 = vsyncadd (%p1021_p1), %s147_s14, 4294967168  ;;  %p1022_p4 = scmp.eq.s32.totalorder %s855_s13, 0 }
  0x47   : > { %791 = dma.done.wait (%p1022_p4), [#allocation6], 16384   ;;  %p1023_p6 = pmov %p1022_p4 }
  0x48   : > { %v242_v0 = vld [vmem:[#allocation5 + $0xf8] sm:$0xff]  ;;  %v241_v2 = vld [vmem:[#allocation5 + $0xf0] sm:$0xff]  ;;  %v240_v4 = vld [vmem:[#allocation5 + $0xe8] sm:$0xff]  ;;  %vm179_vm0 = vcmask 1043456   ;;  %s621_s15 = sshll.u32 %s855_s13, 7  ;;  %s174_s17 = scalar_lea.vmem [#allocation7], %s610_s7 }
  0x49   : > { %793 = vsyncadd (%p1023_p6), [#allocation6], 4294950912  ;;  %v306_v1 = vld [vmem:[#allocation5 + $0x2f8] sm:$0xff]  ;;  %339 = vmatprep.subr.mxu0 %v242_v0  ;;  %v305_v3 = vld [vmem:[#allocation5 + $0x2f0] sm:$0xff]  ;;  %s522_s8 = sshll.u32 %s174_s17, 4  ;;  %s520_s20 = scalar_lea.hbm %s1008_s2, %s621_s15  ;;  %s523_s8 = int_to_ptr.vmem [resolvable:$true] %s522_s8 }
  0x4a   : > { %410 = vmatprep.subr.mxu1 %v306_v1  ;;  %v304_v5 = vld [vmem:[#allocation5 + $0x2e8] sm:$0xff]  ;;  %340 = vmatpush1.msra.mxu0 %v241_v2  ;;  %v239_v6 = vld [vmem:[#allocation5 + $0xe0] sm:$0xff]  ;;  %v238_v8 = vld [vmem:[#allocation5 + $0xd8] sm:$0xff]  ;;  %s508_s23 = scalar_lea.sflag [#allocation4], %s941_s6  ;;  %s744_s24 = scalar_lea.vmem %s523_s8, 128 }
  0x4b   : > { %411 = vmatpush1.msra.mxu1 %v305_v3  ;;  %v303_v7 = vld [vmem:[#allocation5 + $0x2e0] sm:$0xff]  ;;  %341 = vmatprep.subr.mxu0 %v240_v4  ;;  %v302_v9 = vld [vmem:[#allocation5 + $0x2d8] sm:$0xff]  ;;  %v237_v10 = vld [vmem:[#allocation5 + $0xd0] sm:$0xff]  ;;  %p745_p8 = scmp.ne.s32.totalorder %s523_s8, %s744_s24  ;;  %p1024_p3 = scmp.ne.s32.totalorder %s1018_s30, 0 }
  0x4c   : > { %412 = vmatprep.subr.mxu1 %v304_v5  ;;  %v301_v11 = vld [vmem:[#allocation5 + $0x2d0] sm:$0xff]  ;;  %342 = vmatpush1.msra.mxu0 %v239_v6  ;;  %v236_v12 = vld [vmem:[#allocation5 + $0xc8] sm:$0xff]  ;;  %v235_v14 = vld [vmem:[#allocation5 + $0xc0] sm:$0xff]  ;;  %s818_s25 = smov [#allocation7]  }
  0x4d   : > { %413 = vmatpush1.msra.mxu1 %v303_v7  ;;  %v300_v13 = vld [vmem:[#allocation5 + $0x2c8] sm:$0xff]  ;;  %343 = vmatprep.subr.mxu0 %v238_v8  ;;  %v299_v15 = vld [vmem:[#allocation5 + $0x2c0] sm:$0xff]  ;;  %v234_v16 = vld [vmem:[#allocation5 + $0xb8] sm:$0xff]  ;;  %p746_p11 = pnand %p745_p8, %p1024_p3  ;;  %s748_s13 = sshll.u32 %s818_s25, 4  ;;  %s749_s13 = int_to_ptr.vmem [resolvable:$false] %s748_s13 }
  0x4e   : > { %414 = vmatprep.subr.mxu1 %v302_v9  ;;  %344 = vmatpush1.msra.mxu0 %v237_v10  ;;  %v298_v17 = vld [vmem:[#allocation5 + $0x2b8] sm:$0xff]  ;;  %v233_v18 = vld [vmem:[#allocation5 + $0xb0] sm:$0xff]  ;;  %v232_v20 = vld [vmem:[#allocation5 + $0xa8] sm:$0xff]  ;;  %s750_s26 = scalar_lea.vmem %s749_s13, 256  ;;  %p751_p10 = scmp.lt.s32.totalorder %s523_s8, %s749_s13 }
  0x4f   : > { %415 = vmatpush1.msra.mxu1 %v301_v11  ;;  %345 = vmatprep.subr.mxu0 %v236_v12  ;;  %v297_v19 = vld [vmem:[#allocation5 + $0x2b0] sm:$0xff]  ;;  %v296_v21 = vld [vmem:[#allocation5 + $0x2a8] sm:$0xff]  ;;  %v231_v22 = vld [vmem:[#allocation5 + $0xa0] sm:$0xff]  ;;  %p747_p7 = pneg %p746_p11  ;;  %p752_p2 = scmp.lt.s32.totalorder %s750_s26, %s744_s24 }
  0x50   : > { %416 = vmatprep.subr.mxu1 %v300_v13  ;;  %346 = vmatpush1.msra.mxu0 %v235_v14  ;;  %v295_v23 = vld [vmem:[#allocation5 + $0x2a0] sm:$0xff]  ;;  %v230_v24 = vld [vmem:[#allocation5 + $0x98] sm:$0xff]  ;;  %v229_v26 = vld [vmem:[#allocation5 + $0x90] sm:$0xff] }
  0x51   : > { %417 = vmatpush1.msra.mxu1 %v299_v15  ;;  %347 = vmatprep.subr.mxu0 %v234_v16  ;;  %v294_v25 = vld [vmem:[#allocation5 + $0x298] sm:$0xff]  ;;  %v293_v27 = vld [vmem:[#allocation5 + $0x290] sm:$0xff]  ;;  %v228_v28 = vld [vmem:[#allocation5 + $0x88] sm:$0xff]  ;;  %p753_p13 = por %p752_p2, %p751_p10 }
  0x52   : > { %418 = vmatprep.subr.mxu1 %v298_v17  ;;  %348 = vmatpush1.msra.mxu0 %v233_v18  ;;  %v292_v29 = vld [vmem:[#allocation5 + $0x288] sm:$0xff]  ;;  %v227_v30 = vld [vmem:[#allocation5 + $0x80] sm:$0xff]  ;;  %v226_v32 = vld [vmem:[#allocation5 + $0x78] sm:$0xff] }
  0x53   : > { %419 = vmatpush1.msra.mxu1 %v297_v19  ;;  %349 = vmatprep.subr.mxu0 %v232_v20  ;;  %v291_v31 = vld [vmem:[#allocation5 + $0x280] sm:$0xff]  ;;  %v290_v33 = vld [vmem:[#allocation5 + $0x278] sm:$0xff]  ;;  %v225_v34 = vld [vmem:[#allocation5 + $0x70] sm:$0xff]  ;;  %p754_p0 = pnand %p753_p13, %p747_p7 }
  0x54   : > { %420 = vmatprep.subr.mxu1 %v296_v21  ;;  %350 = vmatpush1.msra.mxu0 %v231_v22  ;;  %v289_v35 = vld [vmem:[#allocation5 + $0x270] sm:$0xff]  ;;  %v224_v36 = vld [vmem:[#allocation5 + $0x68] sm:$0xff]  ;;  %v223_v38 = vld [vmem:[#allocation5 + $0x60] sm:$0xff] }
  0x55   : > { %421 = vmatpush1.msra.mxu1 %v295_v23  ;;  %351 = vmatprep.subr.mxu0 %v230_v24  ;;  %v288_v37 = vld [vmem:[#allocation5 + $0x268] sm:$0xff]  ;;  %v287_v39 = vld [vmem:[#allocation5 + $0x260] sm:$0xff]  ;;  %v222_v40 = vld [vmem:[#allocation5 + $0x58] sm:$0xff] }
  0x56   : > { %422 = vmatprep.subr.mxu1 %v294_v25  ;;  %352 = vmatpush1.msra.mxu0 %v229_v26  ;;  %v286_v41 = vld [vmem:[#allocation5 + $0x258] sm:$0xff]  ;;  %v221_v42 = vld [vmem:[#allocation5 + $0x50] sm:$0xff]  ;;  %v220_v44 = vld [vmem:[#allocation5 + $0x48] sm:$0xff] }
  0x57   : > { %423 = vmatpush1.msra.mxu1 %v293_v27  ;;  %353 = vmatprep.subr.mxu0 %v228_v28  ;;  %v285_v43 = vld [vmem:[#allocation5 + $0x250] sm:$0xff]  ;;  %v284_v45 = vld [vmem:[#allocation5 + $0x248] sm:$0xff]  ;;  %v219_v46 = vld [vmem:[#allocation5 + $0x40] sm:$0xff] }
  0x58   : > { %424 = vmatprep.subr.mxu1 %v292_v29  ;;  %354 = vmatpush1.msra.mxu0 %v227_v30  ;;  %v283_v47 = vld [vmem:[#allocation5 + $0x240] sm:$0xff]  ;;  %v218_v48 = vld [vmem:[#allocation5 + $0x38] sm:$0xff]  ;;  %v217_v50 = vld [vmem:[#allocation5 + $0x30] sm:$0xff] }
  0x59   : > { %425 = vmatpush1.msra.mxu1 %v291_v31  ;;  %355 = vmatprep.subr.mxu0 %v226_v32  ;;  %v282_v49 = vld [vmem:[#allocation5 + $0x238] sm:$0xff]  ;;  %v281_v51 = vld [vmem:[#allocation5 + $0x230] sm:$0xff]  ;;  %v216_v52 = vld [vmem:[#allocation5 + $0x28] sm:$0xff] }
  0x5a   : > { %426 = vmatprep.subr.mxu1 %v290_v33  ;;  %356 = vmatpush1.msra.mxu0 %v225_v34  ;;  %v280_v53 = vld [vmem:[#allocation5 + $0x228] sm:$0xff]  ;;  %v215_v54 = vld [vmem:[#allocation5 + $0x20] sm:$0xff]  ;;  %v214_v56 = vld [vmem:[#allocation5 + $0x18] sm:$0xff] }
  0x5b   : > { %427 = vmatpush1.msra.mxu1 %v289_v35  ;;  %357 = vmatprep.subr.mxu0 %v224_v36  ;;  %v279_v55 = vld [vmem:[#allocation5 + $0x220] sm:$0xff]  ;;  %v278_v57 = vld [vmem:[#allocation5 + $0x218] sm:$0xff]  ;;  %v213_v58 = vld [vmem:[#allocation5 + $0x10] sm:$0xff] }
  0x5c   : > { %428 = vmatprep.subr.mxu1 %v288_v37  ;;  %358 = vmatpush1.msra.mxu0 %v223_v38  ;;  %v277_v59 = vld [vmem:[#allocation5 + $0x210] sm:$0xff]  ;;  %v212_v60 = vld [vmem:[#allocation5 + $0x8] sm:$0xff]  ;;  %v211_v62 = vld [vmem:[#allocation5] sm:$0xff] }
  0x5d   : > { %429 = vmatpush1.msra.mxu1 %v287_v39  ;;  %359 = vmatprep.subr.mxu0 %v222_v40  ;;  %v276_v61 = vld [vmem:[#allocation5 + $0x208] sm:$0xff]  ;;  %v275_v63 = vld [vmem:[#allocation5 + $0x200] sm:$0xff]  ;;  %v274_v0 = vld [vmem:[#allocation5 + $0x1f8] sm:$0xff] }
  0x5e   : > { %430 = vmatprep.subr.mxu1 %v286_v41  ;;  %360 = vmatpush1.msra.mxu0 %v221_v42  ;;  %v338_v1 = vld [vmem:[#allocation5 + $0x3f8] sm:$0xff]  ;;  %v273_v2 = vld [vmem:[#allocation5 + $0x1f0] sm:$0xff]  ;;  %v272_v4 = vld [vmem:[#allocation5 + $0x1e8] sm:$0xff] }
  0x5f   : > { %431 = vmatpush1.msra.mxu1 %v285_v43  ;;  %361 = vmatprep.subr.mxu0 %v220_v44  ;;  %v337_v3 = vld [vmem:[#allocation5 + $0x3f0] sm:$0xff]  ;;  %v336_v5 = vld [vmem:[#allocation5 + $0x3e8] sm:$0xff]  ;;  %v271_v6 = vld [vmem:[#allocation5 + $0x1e0] sm:$0xff] }
  0x60   : > { %432 = vmatprep.subr.mxu1 %v284_v45  ;;  %362 = vmatpush1.msra.mxu0 %v219_v46  ;;  %v335_v7 = vld [vmem:[#allocation5 + $0x3e0] sm:$0xff]  ;;  %v270_v8 = vld [vmem:[#allocation5 + $0x1d8] sm:$0xff]  ;;  %v269_v10 = vld [vmem:[#allocation5 + $0x1d0] sm:$0xff] }
  0x61   : > { %433 = vmatpush1.msra.mxu1 %v283_v47  ;;  %363 = vmatprep.subr.mxu0 %v218_v48  ;;  %v334_v9 = vld [vmem:[#allocation5 + $0x3d8] sm:$0xff]  ;;  %v333_v11 = vld [vmem:[#allocation5 + $0x3d0] sm:$0xff]  ;;  %v268_v12 = vld [vmem:[#allocation5 + $0x1c8] sm:$0xff] }
  0x62   : > { %434 = vmatprep.subr.mxu1 %v282_v49  ;;  %364 = vmatpush1.msra.mxu0 %v217_v50  ;;  %v332_v13 = vld [vmem:[#allocation5 + $0x3c8] sm:$0xff]  ;;  %v267_v14 = vld [vmem:[#allocation5 + $0x1c0] sm:$0xff]  ;;  %v266_v16 = vld [vmem:[#allocation5 + $0x1b8] sm:$0xff] }
  0x63   : > { %435 = vmatpush1.msra.mxu1 %v281_v51  ;;  %365 = vmatprep.subr.mxu0 %v216_v52  ;;  %v331_v15 = vld [vmem:[#allocation5 + $0x3c0] sm:$0xff]  ;;  %v330_v17 = vld [vmem:[#allocation5 + $0x3b8] sm:$0xff]  ;;  %v265_v18 = vld [vmem:[#allocation5 + $0x1b0] sm:$0xff] }
  0x64   : > { %436 = vmatprep.subr.mxu1 %v280_v53  ;;  %366 = vmatpush1.msra.mxu0 %v215_v54  ;;  %v329_v19 = vld [vmem:[#allocation5 + $0x3b0] sm:$0xff]  ;;  %v264_v20 = vld [vmem:[#allocation5 + $0x1a8] sm:$0xff]  ;;  %v263_v22 = vld [vmem:[#allocation5 + $0x1a0] sm:$0xff] }
  0x65   : > { %437 = vmatpush1.msra.mxu1 %v279_v55  ;;  %367 = vmatprep.subr.mxu0 %v214_v56  ;;  %v328_v21 = vld [vmem:[#allocation5 + $0x3a8] sm:$0xff]  ;;  %v327_v23 = vld [vmem:[#allocation5 + $0x3a0] sm:$0xff]  ;;  %v262_v24 = vld [vmem:[#allocation5 + $0x198] sm:$0xff] }
  0x66   : > { %438 = vmatprep.subr.mxu1 %v278_v57  ;;  %368 = vmatpush1.msra.mxu0 %v213_v58  ;;  %v326_v25 = vld [vmem:[#allocation5 + $0x398] sm:$0xff]  ;;  %v261_v27 = vld [vmem:[#allocation5 + $0x190] sm:$0xff]  ;;  %v260_v32 = vld [vmem:[#allocation5 + $0x188] sm:$0xff] }
  0x67   : > { %439 = vmatpush1.msra.mxu1 %v277_v59  ;;  %369 = vmatprep.subr.mxu0 %v212_v60  ;;  %v958_v26 = vld [vmem:[%s947_s22] sm:$0xff]  ;;  %v324_v33 = vld [vmem:[#allocation5 + $0x388] sm:$0xff]  ;;  %v259_v36 = vld [vmem:[#allocation5 + $0x180] sm:$0xff] }
  0x68   : > { %440 = vmatprep.subr.mxu1 %v276_v61  ;;  %370 = vmatpush1.msra.mxu0 %v211_v62  ;;  %v325_v28 = vld [vmem:[#allocation5 + $0x390] sm:$0xff]  ;;  %v177_v29 = vcombine.high %v958_v26, %v958_v26  ;;  %v180_v30 = vsel %vm179_vm0, %v958_v26, 0.0  ;;  %v197_v31 = vsel %vm179_vm0, %v958_v26, -inf  ;;  %v323_v37 = vld [vmem:[#allocation5 + $0x380] sm:$0xff]  ;;  %v258_v40 = vld [vmem:[#allocation5 + $0x178] sm:$0xff] }
  0x69   : > { %441 = vmatpush1.msra.mxu1 %v275_v63  ;;  %371 = vmatprep.subr.mxu0 %v274_v0  ;;  %v181_v34 = vrot.slane %v180_v30, 4  ;;  %v198_v35 = vrot.slane %v197_v31, 4  ;;  %v322_v41 = vld [vmem:[#allocation5 + $0x378] sm:$0xff]  ;;  %v257_v46 = vld [vmem:[#allocation5 + $0x170] sm:$0xff]  ;;  %v256_v48 = vld [vmem:[#allocation5 + $0x168] sm:$0xff] }
  0x6a   : > { %442 = vmatprep.subr.mxu1 %v338_v1  ;;  %372 = vmatpush2.msra.mxu0 %v273_v2  ;;  %v187_v38 = vsel %vm179_vm0, %v177_v29, 0.0  ;;  %v204_v39 = vsel %vm179_vm0, %v177_v29, -inf  ;;  %v321_v47 = vld [vmem:[#allocation5 + $0x370] sm:$0xff]  ;;  %v320_v49 = vld [vmem:[#allocation5 + $0x368] sm:$0xff]  ;;  %v255_v53 = vld [vmem:[#allocation5 + $0x160] sm:$0xff] }
  0x6b   : > { %443 = vmatpush2.msra.mxu1 %v337_v3  ;;  %373 = vmatprep.subr.mxu0 %v272_v4  ;;  %v188_v42 = vrot.slane %v187_v38, 4  ;;  %v205_v43 = vrot.slane %v204_v39, 4  ;;  %v182_v44 = vadd.f32 %v181_v34, %v180_v30  ;;  %v199_v45 = vmax.f32 %v197_v31, %v198_v35  ;;  %v319_v54 = vld [vmem:[#allocation5 + $0x360] sm:$0xff]  ;;  %v254_v55 = vld [vmem:[#allocation5 + $0x158] sm:$0xff]  ;;  %v253_v61 = vld [vmem:[#allocation5 + $0x150] sm:$0xff] }
  0x6c   : > { %444 = vmatprep.subr.mxu1 %v336_v5  ;;  %374 = vmatpush2.msra.mxu0 %v271_v6  ;;  %v318_v56 = vld [vmem:[#allocation5 + $0x358] sm:$0xff]  ;;  %v317_v62 = vld [vmem:[#allocation5 + $0x350] sm:$0xff]  ;;  %v252_v63 = vld [vmem:[#allocation5 + $0x148] sm:$0xff] }
  0x6d   : > { %445 = vmatpush2.msra.mxu1 %v335_v7  ;;  %375 = vmatprep.subr.mxu0 %v270_v8  ;;  %v189_v50 = vadd.f32 %v188_v42, %v187_v38  ;;  %v206_v51 = vmax.f32 %v204_v39, %v205_v43  ;;  %v183_v52 = vrot.slane %v182_v44, 2  ;;  %v200_v60 = vrot.slane %v199_v45, 2  ;;  %v316_v0 = vld [vmem:[#allocation5 + $0x348] sm:$0xff]  ;;  %v251_v2 = vld [vmem:[#allocation5 + $0x140] sm:$0xff]  ;;  %v250_v5 = vld [vmem:[#allocation5 + $0x138] sm:$0xff] }
  0x6e   : > { %446 = vmatprep.subr.mxu1 %v334_v9  ;;  %376 = vmatpush2.msra.mxu0 %v269_v10  ;;  %v315_v3 = vld [vmem:[#allocation5 + $0x340] sm:$0xff]  ;;  %v314_v6 = vld [vmem:[#allocation5 + $0x338] sm:$0xff]  ;;  %v249_v10 = vld [vmem:[#allocation5 + $0x130] sm:$0xff] }
  0x6f   : > { %447 = vmatpush2.msra.mxu1 %v333_v11  ;;  %377 = vmatprep.subr.mxu0 %v268_v12  ;;  %v190_v57 = vrot.slane %v189_v50, 2  ;;  %v207_v58 = vrot.slane %v206_v51, 2  ;;  %v184_v59 = vadd.f32 %v183_v52, %v182_v44  ;;  %v201_v9 = vmax.f32 %v199_v45, %v200_v60  ;;  %v313_v11 = vld [vmem:[#allocation5 + $0x330] sm:$0xff]  ;;  %v248_v12 = vld [vmem:[#allocation5 + $0x128] sm:$0xff]  ;;  %v307_v30 = vld [vmem:[#allocation5 + $0x300] sm:$0xff] }
  0x70   : > { %448 = vmatprep.subr.mxu1 %v332_v13  ;;  %378 = vmatpush2.msra.mxu0 %v267_v14  ;;  %v312_v13 = vld [vmem:[#allocation5 + $0x328] sm:$0xff]  ;;  %v493_v45 = vlaneseq }
  0x71   : > { %449 = vmatpush2.msra.mxu1 %v331_v15  ;;  %379 = vmatprep.subr.mxu0 %v266_v16  ;;  %v191_v1 = vadd.f32 %v190_v57, %v189_v50  ;;  %v208_v4 = vmax.f32 %v206_v51, %v207_v58  ;;  %v185_v8 = vrot.slane %v184_v59, 1  ;;  %v247_v15 = vld [vmem:[#allocation5 + $0x120] sm:$0xff] }
  0x72   : > { %450 = vmatprep.subr.mxu1 %v330_v17  ;;  %380 = vmatpush2.msra.mxu0 %v265_v18  ;;  %v311_v16 = vld [vmem:[#allocation5 + $0x320] sm:$0xff]  ;;  %v246_v18 = vld [vmem:[#allocation5 + $0x118] sm:$0xff] }
  0x73   : > { %451 = vmatpush2.msra.mxu1 %v329_v19  ;;  %381 = vmatprep.subr.mxu0 %v264_v20  ;;  %v192_v7 = vrot.slane %v191_v1, 1  ;;  %v209_v17 = vrot.slane %v208_v4, 1  ;;  %v310_v19 = vld [vmem:[#allocation5 + $0x318] sm:$0xff]  ;;  %v186_v20 = vadd.f32 %v185_v8, %v184_v59 }
  0x74   : > { %452 = vmatprep.subr.mxu1 %v328_v21  ;;  %382 = vmatpush2.msra.mxu0 %v263_v22  ;;  %v202_v21 = vrot.slane %v201_v9, 1  ;;  %v245_v22 = vld [vmem:[#allocation5 + $0x110] sm:$0xff] }
  0x75   : > { %453 = vmatpush2.msra.mxu1 %v327_v23  ;;  %383 = vmatprep.subr.mxu0 %v262_v24  ;;  %v193_v14 = vadd.f32 %v192_v7, %v191_v1  ;;  %v309_v23 = vld [vmem:[#allocation5 + $0x310] sm:$0xff]  ;;  %v244_v24 = vld [vmem:[#allocation5 + $0x108] sm:$0xff]  ;;  %v210_v29 = vmax.f32 %v208_v4, %v209_v17  ;;  %v195_v31 = vmul.f32 0.25, %v186_v20 }
  0x76   : > { %454 = vmatprep.subr.mxu1 %v326_v25  ;;  %384 = vmatpush2.msra.mxu0 %v261_v27  ;;  %v308_v25 = vld [vmem:[#allocation5 + $0x308] sm:$0xff] }
  0x77   : > { %455 = vmatpush2.msra.mxu1 %v325_v28  ;;  %385 = vmatprep.subr.mxu0 %v260_v32  ;;  %v196_v27 = vmul.f32 0.25, %v193_v14  ;;  %v243_v28 = vld [vmem:[#allocation5 + $0x100] sm:$0xff]  ;;  %v203_v32 = vmax.f32 %v201_v9, %v202_v21 }
  0x78   : > { %456 = vmatprep.subr.mxu1 %v324_v33  ;;  %386 = vmatpush2.msra.mxu0 %v259_v36 }
  0x79   : > { %457 = vmatpush2.msra.mxu1 %v323_v37  ;;  %387 = vmatprep.subr.mxu0 %v258_v40 }
  0x7a   : > { %458 = vmatprep.subr.mxu1 %v322_v41  ;;  %388 = vmatpush2.msra.mxu0 %v257_v46  ;;  %v494_v46 = vshrl.u32 %v493_v45, 7 }
  0x7b   : > { %459 = vmatpush2.msra.mxu1 %v321_v47  ;;  %389 = vmatprep.subr.mxu0 %v256_v48 }
  0x7c   : > { %460 = vmatprep.subr.mxu1 %v320_v49  ;;  %390 = vmatpush2.msra.mxu0 %v255_v53  ;;  %v495_v47 = vsub.s32 0, %v494_v46 }
  0x7d   : > { %461 = vmatpush2.msra.mxu1 %v319_v54  ;;  %391 = vmatprep.subr.mxu0 %v254_v55 }
  0x7e   : > { %462 = vmatprep.subr.mxu1 %v318_v56  ;;  %392 = vmatpush2.msra.mxu0 %v253_v61 }
  0x7f   : > { %463 = vmatpush2.msra.mxu1 %v317_v62  ;;  %393 = vmatprep.subr.mxu0 %v252_v63 }
  0x80   : > { %464 = vmatprep.subr.mxu1 %v316_v0  ;;  %394 = vmatpush2.msra.mxu0 %v251_v2 }
  0x81   : > { %465 = vmatpush2.msra.mxu1 %v315_v3  ;;  %395 = vmatprep.subr.mxu0 %v250_v5 }
  0x82   : > { %466 = vmatprep.subr.mxu1 %v314_v6  ;;  %396 = vmatpush2.msra.mxu0 %v249_v10 }
  0x83   : > { %467 = vmatpush2.msra.mxu1 %v313_v11  ;;  %397 = vmatprep.subr.mxu0 %v248_v12 }
  0x84   : > { %468 = vmatprep.subr.mxu1 %v312_v13  ;;  %398 = vmatpush2.msra.mxu0 %v247_v15 }
  0x85   : > { %469 = vmatpush2.msra.mxu1 %v311_v16  ;;  %399 = vmatprep.subr.mxu0 %v246_v18 }
  0x86   : > { %470 = vmatprep.subr.mxu1 %v310_v19  ;;  %400 = vmatpush2.msra.mxu0 %v245_v22 }
  0x87   : > { %471 = vmatpush2.msra.mxu1 %v309_v23  ;;  %401 = vmatprep.subr.mxu0 %v244_v24 }
  0x88   : > { %472 = vmatprep.subr.mxu1 %v308_v25  ;;  %402 = vmatpush2.msra.mxu0 %v243_v28 }
  0x89   : > { %403 = vmatprep.mubr.f32.mxu0 %v196_v27  ;;  %473 = vmatpush2.msra.mxu1 %v307_v30 }
  0x8a   : > { %474 = vmatprep.mubr.f32.mxu1 %v210_v29  ;;  %404 = vmatmul.mubr.f32.vlgmr.msra.gmra.mxu0 %v195_v31 }
  0x8b   : > { %475 = vmatmul.mubr.f32.vlgmr.msra.gmra.mxu1 %v203_v32 }
 0x14a   : > { %v405_v33 = vpop.f32.mrf.mxu0 }
 0x14b   : > { %v476_v34 = vpop.f32.mrf.mxu1 }
 0x14c   : > { %v477_v35 = vadd.f32 %v476_v34, %v405_v33  ;;  %v407_v36 = vpop.f32.mrf.mxu0 }
 0x14d   : > { %v478_v37 = vpop.f32.mrf.mxu1 }
 0x14e   : > { %v613_v38 = vmul.f32 -1.442695, %v477_v35  ;;  %v479_v39 = vadd.f32 %v478_v37, %v407_v36 }
 0x150   : > { %682 = vpow2.f32 %v613_v38  ;;  %v614_v40 = vmul.f32 -1.442695, %v479_v39 }
 0x152   : > { %684 = vpow2.f32 %v614_v40 }
 0x15d   : > { %v683_v41 = vpop.eup %682 }
 0x15e   : > { %v487_v42 = vadd.f32 1.0, %v683_v41 }
 0x15f   : > { %v685_v43 = vpop.eup %684 }
 0x160   : > { %686 = vrcp.f32 %v487_v42  ;;  %v488_v44 = vadd.f32 1.0, %v685_v43 }
 0x162   : > { %688 = vrcp.f32 %v488_v44 }
 0x16d   : > { %v687_v48 = vpop.eup %686 }
 0x16e   : > { %v496_v50 = vrot.slane %v687_v48, %v495_v47 }
 0x16f   : > { %v689_v49 = vpop.eup %688 }
 0x170   : > { %v500_v51 = vrot.slane %v689_v49, %v495_v47 }
 0x172   : > { %v503_v52 = vcombine.low %v496_v50, %v500_v51 }
 0x174   : > { %v505_v53 = vmul.f32 %v503_v52, %v958_v26 }
 0x176   : > { %506 = vst [vmem:[%s174_s17] sm:$0xff] %v505_v53 }
 0x177   : > { %757 = shalt.err (!%p754_p0)
}
 0x178   : > { %s758_s27 = scalar_lea.hbm %s520_s20, 128  ;;  %s762_s4 = scalar_lea.hbm %s1008_s2, 256 }
 0x179   : > { %p759_p5 = scmp.ne.s32.totalorder %s520_s20, %s758_s27  ;;  %p763_p1 = scmp.lt.s32.totalorder %s520_s20, %s1008_s2 }
 0x17a   : > { %p764_p4 = scmp.lt.s32.totalorder %s762_s4, %s758_s27 }
 0x17b   : > { %p760_p9 = pnand %p759_p5, %p1024_p3 }
 0x17c   : > { %p765_p6 = por %p764_p4, %p763_p1 }
 0x17d   : > { %p761_p12 = pneg %p760_p9 }
 0x17f   : > { %p766_p8 = pnand %p765_p6, %p761_p12 }
 0x181   : > { %769 = shalt.err (!%p766_p8)
}
 0x182   : > { %628 = dma.vmem_to_hbm [thread:$0]  (%p1024_p3), %s523_s8, 128, %s520_s20, %s508_s23  }
 0x183 PF: > { %s534_s7 = sand.u32 1, %s800_s9   ;;  %p1025_p11 = scmp.ne.s32.totalorder %s1014_s16, 0 }
 0x184   : > { %p1026_p7 = scmp.ge.s32.totalorder %s812_s12, 2  ;;  %s535_s14 = scalar_lea.sflag [#allocation4], %s534_s7 }
 0x186   : > { %p639_p10 = pnand %p1026_p7, %p1025_p11 }
 0x188   : > { %p640_p2 = pneg %p639_p10 }
 0x18a   : > { %795 = dma.done.wait (%p640_p2), %s535_s14, 128  }
 0x18b   : > { %797 = vsyncadd (%p640_p2), %s535_s14, 4294967168  ;;  %p16_p13 = scmp.ge.s32.totalorder %s888_s21, 4   ;;  %s1027_s9 = smov %s804_s10 }
 0x18c   : > { %s1028_s10 = smov %s808_s11  ;;  %s1029_s11 = smov %s905_s29 }
 0x18d   : > { %s1030_s12 = smov %s888_s21  ;;  %18 = sbr.rel (!%p16_p13) target bundleno = 6 (0x6), region = 77 }
 0x192   :  { %540 = vsyncpa [#allocation3], 1 }
 0x193   :  { %542 = vsyncpa [#allocation3 + $0x1], 1 }
 0x194   :  { %543 = vsyncpa [#allocation6], 1 }
 0x195   :  { %544 = vsyncpa [#allocation4], 1 }
 0x196   :  { %546 = vsyncpa [#allocation4 + $0x1], 1 }

</bundles_post_ra>
